<compile_context>
chip_gen: v6e
topology: v6e:2x2x1
jax: 0.10.0
libtpu: 0.0.40
codegen_flags: <defaults>
</compile_context>

<pallas_src>
import jax
import jax.numpy as jnp
from jax import lax
from jax.experimental import pallas as pl
from jax.experimental.pallas import tpu as pltpu

FEATURE_DIM = 64
HIDDEN_DIM = 128
OUTPUT_DIM = 3


def _round_up(x, m):
    return (x + m - 1) // m * m


def _cdiv(a, b):
    return -(-a // b)


def _device_tile_defaults():
    """Per-generation (default row tile, scoped-VMEM limit)."""
    try:
        kind = jax.devices()[0].device_kind.lower()
    except Exception:
        kind = ""
    if "7" in kind:
        # v7x: 3.2 TB/s HBM, 64 MiB VMEM/TC -> 4 MiB HBM tiles, 48 MiB scope.
        return 16384, 48 << 20
    # v5e/v6e: 128 MiB VMEM -> 2 MiB HBM tiles, raise v5e's 16 MiB default.
    return 8192, 64 << 20


def _decoder_kernel(x_ref, w1_ref, b1_ref, w2_ref, b2_ref, o_ref):
    # x_ref:  (tm, feature_dim)                   natural row-major input tile
    # w1_ref: (feature_dim, hidden)               b1_ref: (1, hidden)   [f32]
    # w2_ref: (out_dim, hidden)  (PyTorch layout) b2_ref: (out_dim, 1)  [f32]
    # o_ref:  (out_dim, tm)                       lane-dense transposed output
    x = x_ref[...]
    h = jnp.dot(x, w1_ref[...], preferred_element_type=jnp.float32)
    h = jnp.maximum(h + b1_ref[...], 0.0)          # bias + ReLU in f32 (VPU)
    # y_T = w2 @ h^T  -> (out_dim, tm): contract last dims of both operands
    # (same NT pattern as q @ k^T) so the store stays lane-dense.
    y_t = lax.dot_general(
        w2_ref[...], h.astype(w2_ref.dtype),
        dimension_numbers=(((1,), (1,)), ((), ())),
        preferred_element_type=jnp.float32,
    )
    y_t = y_t + b2_ref[...]                        # (out_dim, 1) lane broadcast
    o_ref[...] = y_t.astype(o_ref.dtype)


def neural_rendering_decoder(features, w1, b1, w2, b2, *, tm=None,
                             return_transposed=False):
    """features: [..., feature_dim] -> [..., output_dim]

    w1: [hidden, feature_dim] (PyTorch layout)   b1: [hidden]
    w2: [output_dim, hidden]  (PyTorch layout)   b2: [output_dim]

    Compute dtype follows `features.dtype` (pass bf16 features for the bf16
    MXU path; no wrapper-side cast is performed -- that would add an extra
    full-array HBM pass).  `return_transposed=True` returns the channel-major
    (output_dim, N) result and skips the final transpose pass.
    """
    lead_shape = features.shape[:-1]
    fdim = features.shape[-1]
    hidden = w1.shape[0]
    out_dim = w2.shape[0]
    out_dtype = features.dtype

    x = features.reshape(-1, fdim)                 # free (contiguous reshape)
    n = x.shape[0]
    if n == 0:
        return jnp.zeros((*lead_shape, out_dim), dtype=out_dtype)

    # Weights are tiny (<40 KiB): casting them to the input dtype is free.
    # Biases stay f32 for the epilogue on every generation.
    w1_t = w1.T.astype(x.dtype)                    # (feature_dim, hidden)
    w2_c = w2.astype(x.dtype)                      # (out_dim, hidden)
    b1_r = b1.astype(jnp.float32).reshape(1, hidden)
    b2_r = b2.astype(jnp.float32).reshape(out_dim, 1)

    default_tm, vmem_limit = _device_tile_defaults()
    if tm is None:
        tm = default_tm
    tm = max(128, _round_up(int(tm), 128))

    if n <= tm and n <= 1024:
        # Single block whose dims equal the full array dims: no ragged block,
        # no padding.  NOTE: for n not a multiple of 128 the lane-dense-output
        # property disappears in this regime; harmless at small N.
        tm_eff = n
    else:
        # Multiple of 128 (lane-dense transposed output tiles), capped at
        # ceil(n/2) so the "parallel" axis has >=2 steps (v7x has 2 TCs).
        tm_eff = min(tm, max(128, _round_up(_cdiv(n, 2), 128)))

    grid = (_cdiv(n, tm_eff),)
    # No jnp.pad of x: the ragged last block is handled by Pallas boundary
    # masking.  OOB input rows read unspecified values but only feed the
    # matching OOB output lanes, whose stores are dropped (no row mixing).

    in_bytes = jnp.dtype(x.dtype).itemsize
    out_bytes = jnp.dtype(out_dtype).itemsize
    cost = pl.CostEstimate(
        flops=2 * n * (fdim * hidden + hidden * out_dim),
        transcendentals=0,
        bytes_accessed=(n * fdim * in_bytes
                        + (fdim * hidden + out_dim * hidden) * in_bytes
                        + (hidden + out_dim) * 4
                        + n * out_dim * out_bytes),
    )

    out_t = pl.pallas_call(
        _decoder_kernel,
        out_shape=jax.ShapeDtypeStruct((out_dim, n), out_dtype),
        grid_spec=pltpu.PrefetchScalarGridSpec(
            num_scalar_prefetch=0,
            grid=grid,
            in_specs=[
                pl.BlockSpec((tm_eff, fdim), lambda i: (i, 0)),
                pl.BlockSpec((fdim, hidden), lambda i: (0, 0)),
                pl.BlockSpec((1, hidden), lambda i: (0, 0)),
                pl.BlockSpec((out_dim, hidden), lambda i: (0, 0)),
                pl.BlockSpec((out_dim, 1), lambda i: (0, 0)),
            ],
            out_specs=pl.BlockSpec((out_dim, tm_eff), lambda i: (0, i)),
        ),
        compiler_params=pltpu.CompilerParams(
            dimension_semantics=("parallel",),     # shards rows across v7x TCs
            vmem_limit_bytes=vmem_limit,
        ),
        cost_estimate=cost,
    )(x, w1_t, b1_r, w2_c, b2_r)

    if return_transposed:
        return out_t                               # channel-major (out_dim, N)
    # The final transpose is a small (~out_dim*N*itemsize) XLA pass; under jit
    # it typically fuses into the consumer.  Use return_transposed to skip it.
    return out_t.T.reshape(*lead_shape, out_dim)


def _ref_forward(features, w1, b1, w2, b2):
    h = jnp.maximum(features @ w1.T + b1, 0.0)
    return h @ w2.T + b2


if __name__ == "__main__":
    key = jax.random.PRNGKey(0)
    k_x, k_w1, k_b1, k_w2, k_b2, k_x2, k_x3 = jax.random.split(key, 7)

    # PyTorch Linear shapes: weight [out, in].
    w1 = jax.random.normal(k_w1, (HIDDEN_DIM, FEATURE_DIM), dtype=jnp.float32) * 0.05
    b1 = jax.random.normal(k_b1, (HIDDEN_DIM,), dtype=jnp.float32) * 0.01
    w2 = jax.random.normal(k_w2, (OUTPUT_DIM, HIDDEN_DIM), dtype=jnp.float32) * 0.05
    b2 = jax.random.normal(k_b2, (OUTPUT_DIM,), dtype=jnp.float32) * 0.01

    # --- Test 1: small batch (exact single block), f32 ---
    features = jax.random.normal(k_x, (2, 8, FEATURE_DIM), dtype=jnp.float32)
    out = jax.block_until_ready(neural_rendering_decoder(features, w1, b1, w2, b2))
    ref = _ref_forward(features, w1, b1, w2, b2)
    assert out.shape == (2, 8, OUTPUT_DIM), out.shape
    assert jnp.allclose(out, ref, atol=1e-5, rtol=1e-5), "f32 mismatch (small)"

    # --- Test 2: non-tile-multiple N, multi-step grid with ragged last block ---
    features2 = jax.random.normal(k_x2, (2, 200, FEATURE_DIM), dtype=jnp.float32)
    out2 = jax.block_until_ready(
        neural_rendering_decoder(features2, w1, b1, w2, b2, tm=128))
    ref2 = _ref_forward(features2, w1, b1, w2, b2)
    assert out2.shape == (2, 200, OUTPUT_DIM), out2.shape
    assert jnp.allclose(out2, ref2, atol=1e-5, rtol=1e-5), "f32 mismatch (ragged)"

    # --- Test 3: larger N, default tile, >=2 parallel grid steps ---
    features3 = jax.random.normal(k_x3, (1, 2048, FEATURE_DIM), dtype=jnp.float32)
    out3 = jax.block_until_ready(neural_rendering_decoder(features3, w1, b1, w2, b2))
    ref3 = _ref_forward(features3, w1, b1, w2, b2)
    assert out3.shape == (1, 2048, OUTPUT_DIM), out3.shape
    assert jnp.allclose(out3, ref3, atol=1e-5, rtol=1e-5), "f32 mismatch (large)"

    # --- Test 4: bf16-at-rest features (bf16 MXU path, f32 accumulation) ---
    out_bf16 = jax.block_until_ready(
        neural_rendering_decoder(features.astype(jnp.bfloat16), w1, b1, w2, b2))
    assert out_bf16.shape == (2, 8, OUTPUT_DIM), out_bf16.shape
    assert jnp.allclose(out_bf16.astype(jnp.float32), ref, atol=5e-2, rtol=5e-2), \
        "bf16 mismatch"

    print("KERNEL_OK")
</pallas_src>

<mosaic_0001>
module attributes {stable_mosaic.version = 11 : i64} {
  func.func @_decoder_kernel(%arg0: i32, %arg1: memref<16x64xf32, #tpu.memory_space<vmem>>, %arg2: memref<64x128xf32, #tpu.memory_space<vmem>>, %arg3: memref<1x128xf32, #tpu.memory_space<vmem>>, %arg4: memref<3x128xf32, #tpu.memory_space<vmem>>, %arg5: memref<3x1xf32, #tpu.memory_space<vmem>>, %arg6: memref<3x16xf32, #tpu.memory_space<vmem>>) attributes {dimension_semantics = [#tpu.dimension_semantics<parallel>], iteration_bounds = array<i64: 1>, scalar_prefetch = 0 : i64, scratch_operands = 0 : i64, tpu.core_type = #tpu.core_type<tc>, window_params = [{transform_indices = @transform_0, window_bounds = array<i64: 16, 64>}, {pipeline_mode = #tpu.pipeline_mode<synchronous>, transform_indices = @transform_1, window_bounds = array<i64: 64, 128>}, {pipeline_mode = #tpu.pipeline_mode<synchronous>, transform_indices = @transform_2, window_bounds = array<i64: 1, 128>}, {pipeline_mode = #tpu.pipeline_mode<synchronous>, transform_indices = @transform_3, window_bounds = array<i64: 3, 128>}, {pipeline_mode = #tpu.pipeline_mode<synchronous>, transform_indices = @transform_4, window_bounds = array<i64: 3, 1>}, {transform_indices = @transform_5, window_bounds = array<i64: 3, 16>}]} {
    %c0 = arith.constant 0 : index
    %c0_0 = arith.constant 0 : index
    %0 = vector.load %arg1[%c0, %c0_0] : memref<16x64xf32, #tpu.memory_space<vmem>>, vector<16x64xf32>
    %c0_1 = arith.constant 0 : index
    %c0_2 = arith.constant 0 : index
    %1 = vector.load %arg2[%c0_1, %c0_2] : memref<64x128xf32, #tpu.memory_space<vmem>>, vector<64x128xf32>
    %cst = arith.constant dense<0.000000e+00> : vector<16x128xf32>
    %2 = tpu.matmul %0, %1, %cst {dimension_numbers = #tpu.dot_dimension_numbers<[1], [0], [0], [1], [0, 0, 1, 1], [], []>} : vector<16x64xf32>, vector<64x128xf32>, vector<16x128xf32> -> vector<16x128xf32>
    %c0_3 = arith.constant 0 : index
    %c0_4 = arith.constant 0 : index
    %3 = vector.load %arg3[%c0_3, %c0_4] : memref<1x128xf32, #tpu.memory_space<vmem>>, vector<1x128xf32>
    %4 = vector.broadcast %3 : vector<1x128xf32> to vector<16x128xf32>
    %5 = arith.addf %2, %4 : vector<16x128xf32>
    %cst_5 = arith.constant 0.000000e+00 : f32
    %6 = vector.broadcast %cst_5 : f32 to vector<16x128xf32>
    %7 = arith.maximumf %5, %6 : vector<16x128xf32>
    %c0_6 = arith.constant 0 : index
    %c0_7 = arith.constant 0 : index
    %8 = vector.load %arg4[%c0_6, %c0_7] : memref<3x128xf32, #tpu.memory_space<vmem>>, vector<3x128xf32>
    %cst_8 = arith.constant dense<0.000000e+00> : vector<3x16xf32>
    %9 = tpu.matmul %8, %7, %cst_8 {dimension_numbers = #tpu.dot_dimension_numbers<[1], [1], [0], [0], [0, 0, 1, 0], [], []>} : vector<3x128xf32>, vector<16x128xf32>, vector<3x16xf32> -> vector<3x16xf32>
    %c0_9 = arith.constant 0 : index
    %c0_10 = arith.constant 0 : index
    %10 = vector.load %arg5[%c0_9, %c0_10] : memref<3x1xf32, #tpu.memory_space<vmem>>, vector<3x1xf32>
    %11 = vector.broadcast %10 : vector<3x1xf32> to vector<3x16xf32>
    %12 = arith.addf %9, %11 : vector<3x16xf32>
    %c0_11 = arith.constant 0 : index
    %c0_12 = arith.constant 0 : index
    %13 = vector.load %arg6[%c0_11, %c0_12] : memref<3x16xf32, #tpu.memory_space<vmem>>, vector<3x16xf32>
    tpu.vector_store %arg6[%c0_11, %c0_12], %12 {strides = array<i32>} : memref<3x16xf32, #tpu.memory_space<vmem>>, vector<3x16xf32>,
    return
  }
  func.func @transform_0(%arg0: i32) -> (i32, i32) {
    %c0_i32 = arith.constant 0 : i32
    %c0_i32_0 = arith.constant 0 : i32
    return %arg0, %c0_i32 : i32, i32
  }
  func.func @transform_1(%arg0: i32) -> (i32, i32) {
    %c0_i32 = arith.constant 0 : i32
    %c0_i32_0 = arith.constant 0 : i32
    %c0_i32_1 = arith.constant 0 : i32
    return %c0_i32, %c0_i32_0 : i32, i32
  }
  func.func @transform_2(%arg0: i32) -> (i32, i32) {
    %c0_i32 = arith.constant 0 : i32
    %c0_i32_0 = arith.constant 0 : i32
    %c0_i32_1 = arith.constant 0 : i32
    return %c0_i32, %c0_i32_0 : i32, i32
  }
  func.func @transform_3(%arg0: i32) -> (i32, i32) {
    %c0_i32 = arith.constant 0 : i32
    %c0_i32_0 = arith.constant 0 : i32
    %c0_i32_1 = arith.constant 0 : i32
    return %c0_i32, %c0_i32_0 : i32, i32
  }
  func.func @transform_4(%arg0: i32) -> (i32, i32) {
    %c0_i32 = arith.constant 0 : i32
    %c0_i32_0 = arith.constant 0 : i32
    %c0_i32_1 = arith.constant 0 : i32
    return %c0_i32, %c0_i32_0 : i32, i32
  }
  func.func @transform_5(%arg0: i32) -> (i32, i32) {
    %c0_i32 = arith.constant 0 : i32
    %c0_i32_0 = arith.constant 0 : i32
    return %c0_i32, %arg0 : i32, i32
  }
}

</mosaic_0001>

<bundles_post_ra>
// kernel: tpu_custom_call.1
= control target key start
LH: loop header
LB: loop body
LE: loop exit
PB: predicated region body
PF: predicated region fallthrough
CT: control target
= control target key end

     0   :  { %10 = vsyncpa [#allocation3], 0  ;;  %s420_s0 = inlined_call_operand.hbm [shape: f32[16,64], index: 0, kind: input, shape index: {}]   ;;  %s421_s1 = inlined_call_operand.hbm [shape: f32[64,128], index: 1, kind: input, shape index: {}]   ;;  %s422_s2 = inlined_call_operand.vmem [shape: f32[1,128], index: 2, kind: input, shape index: {}]   ;;  %s423_s3 = inlined_call_operand.vmem [shape: f32[3,128], index: 3, kind: input, shape index: {}]   ;;  %s424_s4 = inlined_call_operand.vmem [shape: f32[3,1], index: 4, kind: input, shape index: {}]   ;;  %s425_s5 = inlined_call_operand.hbm [shape: f32[3,16], index: 5, kind: output, shape index: {}]  }
   0x1   :  { %11 = vsyncpa [#allocation6], 0 }
   0x2   :  { %12 = vsyncpa [#allocation4], 0  ;;  %s362_s18 = smov [#allocation2]  }
   0x3   :  { %s18_s19 = sshll.u32 %s362_s18, 4  ;;  %s19_s19 = int_to_ptr.vmem [resolvable:$true] %s18_s19 }
   0x4   :  { %s304_s20 = scalar_lea.vmem %s19_s19, 256  ;;  %p309_p1 = scmp.lt.s32.totalorder %s19_s19, %s19_s19 }
   0x5   :  { %p305_p0 = scmp.ne.s32.totalorder %s19_s19, %s304_s20  ;;  %p310_p2 = scmp.lt.s32.totalorder %s304_s20, %s304_s20 }
   0x7   :  { %p311_p3 = por %p310_p2, %p309_p1 }
   0x9   :  { %p312_p4 = pnand %p311_p3, %p305_p0 }
   0xb   :  { %315 = shalt.err (!%p312_p4)
}
   0xc   :  { %s363_s21 = smov 128   ;;  %s364_s22 = smov 8  }
   0xd   :  { %24 = dma.hbm_to_vmem [thread:$0]  %s420_s0, 256, %s19_s19, [#allocation3], %s363_s21, %s363_s21, %s364_s22  }
   0xe   :  { %s365_s25 = smov [#allocation5]  }
   0xf   :  { %s30_s26 = sshll.u32 %s365_s25, 4  ;;  %s31_s26 = int_to_ptr.vmem [resolvable:$true] %s30_s26 }
  0x10   :  { %s324_s27 = scalar_lea.vmem %s31_s26, 1024  ;;  %p329_p6 = scmp.lt.s32.totalorder %s31_s26, %s31_s26 }
  0x11   :  { %p325_p5 = scmp.ne.s32.totalorder %s31_s26, %s324_s27  ;;  %p330_p7 = scmp.lt.s32.totalorder %s324_s27, %s324_s27 }
  0x13   :  { %p331_p8 = por %p330_p7, %p329_p6 }
  0x15   :  { %p332_p9 = pnand %p331_p8, %p325_p5 }
  0x17   :  { %335 = shalt.err (!%p332_p9)
}
  0x18   :  { %36 = dma.hbm_to_vmem [thread:$0]  %s421_s1, 1024, %s31_s26, [#allocation6], %s363_s21, %s363_s21, %s364_s22  }
  0x19   :  { %356 = dma.done.wait [#allocation3], 256  }
  0x1a   :  { %357 = vsyncadd [#allocation3], 4294967040 }
  0x1b   :  { %358 = dma.done.wait [#allocation6], 1024  }
  0x1c   :  { %359 = vsyncadd [#allocation6], 4294966272  ;;  %v58_v0 = vld [vmem:[#allocation5 + $0x38] sm:$0xff]  ;;  %v57_v1 = vld [vmem:[#allocation5 + $0x30] sm:$0xff]  ;;  %vm66_vm0 = vcmask 523264   ;;  %v366_v10 = vmov 0.0  }
  0x1d   :  { %261 = vmatprep.subr.mxu0 %v58_v0  ;;  %v56_v2 = vld [vmem:[#allocation5 + $0x28] sm:$0xff]  ;;  %v49_v3 = vld [vmem:[#allocation2] sm:$0xff]  ;;  %v55_v4 = vld [vmem:[#allocation5 + $0x20] sm:$0xff]  ;;  %280 = vmatprep.subr.mxu1 %v366_v10  ;;  %vm367_vm1 = vmmov 0   ;;  %v368_v12 = vmov 0   ;;  %vm227_vm2 = vcmask 124928  }
  0x1e   :  { %262 = vmatpush3.msra.mxu0 %v58_v0  ;;  %277 = vmatprep.mubr.msk.f32.mxu0 %vm66_vm0, %v49_v3  ;;  %v54_v5 = vld [vmem:[#allocation5 + $0x18] sm:$0xff]  ;;  %v53_v6 = vld [vmem:[#allocation5 + $0x10] sm:$0xff]  ;;  %v52_v7 = vld [vmem:[#allocation5 + $0x8] sm:$0xff] }
  0x1f   :  { %263 = vmatprep.subr.mxu0 %v57_v1  ;;  %v51_v8 = vld [vmem:[#allocation5] sm:$0xff]  ;;  %v50_v9 = vld [vmem:[#allocation2 + $0x8] sm:$0xff]  ;;  %284 = vmatprep.mubr.msk.f32.mxu1 %vm367_vm1, %v366_v10  ;;  %v151_v11 = vld [vmem:[%s424_s4] sm:$0x7]  ;;  %s369_s4 = smov [#allocation7]  }
  0x20   :  { %264 = vmatpush3.msra.mxu0 %v57_v1  ;;  %295 = vset.pattern.permute.xlu0 %v368_v12  ;;  %v245_v13 = vld [vmem:[%s422_s2] ss:$0 sm:$0xff]  ;;  %s235_s9 = sshll.u32 %s369_s4, 4  ;;  %s236_s9 = int_to_ptr.vmem [resolvable:$true] %s235_s9 }
  0x21   :  { %265 = vmatprep.subr.mxu0 %v56_v2  ;;  %154 = vperm.xlu0 %295, %v151_v11   ;;  %v150_v20 = vld [vmem:[%s423_s3] sm:$0x7]  ;;  %s336_s2 = scalar_lea.vmem %s236_s9, 64  ;;  %p341_p11 = scmp.lt.s32.totalorder %s236_s9, %s236_s9 }
  0x22   :  { %266 = vmatpush3.msra.mxu0 %v56_v2  ;;  %p337_p10 = scmp.ne.s32.totalorder %s236_s9, %s336_s2  ;;  %p342_p12 = scmp.lt.s32.totalorder %s336_s2, %s336_s2 }
  0x23   :  { %267 = vmatprep.subr.mxu0 %v55_v4 }
  0x24   :  { %268 = vmatpush3.msra.mxu0 %v55_v4  ;;  %p343_p13 = por %p342_p12, %p341_p11 }
  0x25   :  { %269 = vmatprep.subr.mxu0 %v54_v5 }
  0x26   :  { %270 = vmatpush3.msra.mxu0 %v54_v5  ;;  %p344_p0 = pnand %p343_p13, %p337_p10 }
  0x27   :  { %271 = vmatprep.subr.mxu0 %v53_v6 }
  0x28   :  { %272 = vmatpush3.msra.mxu0 %v53_v6 }
  0x29   :  { %273 = vmatprep.subr.mxu0 %v52_v7 }
  0x2a   :  { %274 = vmatpush3.msra.mxu0 %v52_v7 }
  0x2b   :  { %275 = vmatprep.subr.mxu0 %v51_v8 }
  0x2c   :  { %276 = vmatpush3.msra.mxu0 %v51_v8 }
  0x2d   :  { %278 = vmatmul.mubr.msk.f32.vlgmr.msra.gmra.mxu0 %vm66_vm0, %v50_v9 }
  0x9c   :  { %v155_v21 = vpop.permute.xlu0 %154 }
  0xed   :  { %v279_v14 = vpop.f32.mrf.mxu0 }
  0xee   :  { %v145_v15 = vadd.f32 %v279_v14, %v245_v13 }
  0xef   :  { %v139_v16 = vpop.f32.mrf.mxu0 }
  0xf0   :  { %v149_v17 = vmax.f32 %v145_v15, 0.0  ;;  %v140_v18 = vadd.f32 %v245_v13, %v139_v16 }
  0xf2   :  { %281 = vmatpush3.xpose.msra.mxu1 %v149_v17  ;;  %v148_v19 = vmax.f32 %v140_v18, 0.0 }
  0xf3   :  { %282 = vmatprep.subr.mxu1 %v366_v10 }
  0xf6   :  { %283 = vmatpush3.xpose.msra.mxu1 %v148_v19 }
  0xf9   :  { %285 = vmatmul.mubr.f32.vlgmr.msra.gmra.mxu1 %v150_v20 }
 0x1b9   :  { %v223_v22 = vpop.f32.mrf.mxu1 }
 0x1ba   :  { %v224_v23 = vadd.f32 %v223_v22, %v155_v21 }
 0x1bb   :  { %v286_v24 = vpop.f32.mrf.mxu1 }
 0x1bc   :  { %228 = vst.msk [vmem:[#allocation7] sm:$0x7] %vm227_vm2, %v224_v23 }
 0x1bd   :  { %347 = shalt.err (!%p344_p0)
}
 0x1be   :  { %238 = dma.vmem_to_hbm [thread:$0]  %s236_s9, 64, %s425_s5, [#allocation4]  }
 0x1bf   :  { %360 = dma.done.wait [#allocation4], 64  }
 0x1c0   :  { %361 = vsyncadd [#allocation4], 4294967232 }
 0x1c1   :  { %242 = vsyncpa [#allocation3], 1 }
 0x1c2   :  { %243 = vsyncpa [#allocation6], 1 }
 0x1c3   :  { %244 = vsyncpa [#allocation4], 1 }

</bundles_post_ra>
